<compile_context>
chip_gen: v7x
topology: tpu7x:2x2x1
jax: 0.10.0
libtpu: 0.0.40
codegen_flags: <defaults>
</compile_context>

<pallas_src>
import functools

import jax
import jax.numpy as jnp
from jax import lax
from jax.experimental import pallas as pl
from jax.experimental.pallas import tpu as pltpu

KH = KW = 3
STRIDE = 2
PAD = 1
OUT_PAD = 1

_TAPS = ((0, 0), (0, 1), (1, 0), (1, 1))  # (dy, dx) input taps per 2x2 phase
_LANE = 128


def _ki_of(parity, delta):
    """Kernel index (of the equivalent stride-1 conv) that feeds output parity
    `parity` from input offset `delta`; None if that tap is identically zero."""
    if parity == 0 and delta == 0:
        return 1
    if parity == 1 and delta == 0:
        return 0
    if parity == 1 and delta == 1:
        return 2
    return None  # (parity=0, delta=1): even outputs never read x[. + 1]


def _round_up(x, m):
    return (x + m - 1) // m * m


def _deconv_phase_kernel(xa_ref, xb_ref, w_ref, b_ref, o_ref, *, w_out):
    """Fused single-matmul sub-pixel transposed conv for one (batch, row-tile).

    xa_ref: (1, th, Wp, Cin)    input rows a      (right zero-padded width)
    xb_ref: (1, th, Wp, Cin)    input rows a + 1  (zero row past the bottom)
    w_ref:  (4*Cin, Cout4p)     fused phase weights, tap-major along K
    b_ref:  (1, Cout4p)         bias tiled over the 4 phases (zero in padding)
    o_ref:  (1, th*W, Cout4p)   (a, b)-flattened rows, phases fused on lanes
    """
    th = xa_ref.shape[1]
    cin = xa_ref.shape[3]

    xa = xa_ref[0]                       # (th, Wp, Cin)
    xb = xb_ref[0]                       # (th, Wp, Cin)

    # 2x2-window im2col along lanes; tap order matches _TAPS / w_ref's K axis.
    patch = jnp.concatenate(
        [xa[:, 0:w_out, :], xa[:, 1:w_out + 1, :],
         xb[:, 0:w_out, :], xb[:, 1:w_out + 1, :]],
        axis=-1,
    ).reshape(th * w_out, 4 * cin)       # (th*W, 4*Cin)

    # One MXU push per tile; the f32 accumulator IS the stored block.
    acc = jnp.dot(patch, w_ref[...], preferred_element_type=jnp.float32)
    acc = acc + b_ref[...]
    o_ref[0] = acc.astype(o_ref.dtype)


def _build_phase_weights(w_t, dtype, cout4_pad):
    """w_t (Cin, Cout, 3, 3) ConvTranspose2d weight ->
       (4*Cin, cout4_pad): W[t*Cin + ci, (2*py + px)*Cout + co], zero taps and
       lane padding folded in."""
    cin, cout = w_t.shape[0], w_t.shape[1]
    # Equivalent stride-1 conv weight: w_conv[ki,kj,ci,co] = w_t[ci,co,2-ki,2-kj]
    w_conv = jnp.transpose(jnp.flip(w_t, axis=(2, 3)), (2, 3, 0, 1)).astype(
        jnp.float32)
    blocks = jnp.zeros((4, cin, 4, cout), jnp.float32)
    for t, (dy, dx) in enumerate(_TAPS):
        for py in (0, 1):
            ki = _ki_of(py, dy)
            if ki is None:
                continue
            for px in (0, 1):
                kj = _ki_of(px, dx)
                if kj is None:
                    continue
                blocks = blocks.at[t, :, 2 * py + px, :].set(w_conv[ki, kj])
    w_big = blocks.reshape(4 * cin, 4 * cout)
    w_big = jnp.pad(w_big, ((0, 0), (0, cout4_pad - 4 * cout)))
    return w_big.astype(dtype)


def _vmem_capacity_bytes():
    """Physical VMEM per TensorCore; falls back to the smallest (v7x, 64 MiB)."""
    try:
        return int(pltpu.get_tpu_info().vmem_capacity_bytes)
    except Exception:
        return 64 << 20


def _pick_row_tile(h, w, per_tile_bytes, budget):
    """Largest divisor th of h whose per-step footprint fits `budget`,
    preferring (th*w) % 8 == 0 (tile-aligned reshape) and >= 2 row tiles
    (pipeline depth + megacore split on v7x)."""
    fits = [t for t in range(1, h + 1)
            if h % t == 0 and per_tile_bytes(t) <= budget]
    if not fits:
        return 1
    for pred in (lambda t: (t * w) % 8 == 0 and h // t >= 2,
                 lambda t: h // t >= 2,
                 lambda t: True):
        good = [t for t in fits if pred(t)]
        if good:
            return max(good)
    return max(fits)


@functools.partial(jax.jit, static_argnames=("use_bf16",))
def upsampling_block(x_nchw, w_t, bias, use_bf16=False):
    """Forward of UpSamplingBlock.

    x_nchw: (N, Cin, H, W)       PyTorch NCHW layout
    w_t:    (Cin, Cout, KH, KW)  PyTorch ConvTranspose2d weight layout
    bias:   (Cout,)
    returns (N, Cout, 2H, 2W) in NCHW.
    """
    n, cin, h, w = x_nchw.shape
    cout = w_t.shape[1]
    out_dtype = x_nchw.dtype
    mm_dtype = jnp.bfloat16 if use_bf16 else out_dtype

    cout4 = 4 * cout
    cout4_pad = _round_up(cout4, _LANE)        # lane-dense output / MXU N dim
    w_padded = _round_up(w + 1, 8)             # sublane-aligned padded width

    in_item = jnp.dtype(mm_dtype).itemsize
    out_item = jnp.dtype(out_dtype).itemsize

    # ---- generation-aware tiling -----------------------------------------
    vmem_cap = _vmem_capacity_bytes()
    # Per-step footprint target ~1/12 of physical VMEM (~10 MiB on the
    # 128 MiB v5e/v6e, ~5 MiB on the 64 MiB v7x).
    budget = min(max(vmem_cap // 12, 2 << 20), 16 << 20)

    def per_tile_bytes(th):
        return (2 * 2 * th * w_padded * cin * in_item   # 2 inputs, double-buffered
                + th * w * 4 * cin * in_item            # im2col patch
                + 2 * th * w * cout4_pad * out_item     # output block, double-buffered
                + th * w * cout4_pad * 4)               # f32 accumulator

    th = _pick_row_tile(h, w, per_tile_bytes, budget)
    r_tiles = h // th

    # ---- HBM-side glue (all O(input) work; no dilated tensor, no halo) ----
    x_nhwc = jnp.transpose(x_nchw, (0, 2, 3, 1)).astype(mm_dtype)   # (N,H,W,Cin)
    x_padded = jnp.pad(x_nhwc, ((0, 0), (0, 1), (0, w_padded - w), (0, 0)))
    x_a = x_padded[:, 0:h]          # rows a        (N, H, Wp, Cin)
    x_b = x_padded[:, 1:h + 1]      # rows a + 1    (zero row = output_padding)

    w_big = _build_phase_weights(w_t, mm_dtype, cout4_pad)          # (4Cin, C4p)
    b_big = jnp.pad(jnp.tile(bias.astype(jnp.float32), 4),
                    (0, cout4_pad - cout4)).reshape(1, cout4_pad)

    flops = 2 * n * h * w * (4 * cin) * cout4_pad
    bytes_accessed = (2 * x_a.size * in_item + w_big.size * in_item
                      + b_big.size * 4 + n * h * w * cout4_pad * out_item)

    # Scoped-VMEM hint: generous on v5e/v6e (128 MiB physical), capped at
    # ~3/4 of physical on v7x (64 MiB) with headroom for compiler scratch.
    vmem_limit = int(min(max(2 * per_tile_bytes(th) + (8 << 20), 16 << 20),
                         (vmem_cap * 3) // 4))

    kernel = functools.partial(_deconv_phase_kernel, w_out=w)

    out_flat = pl.pallas_call(
        kernel,
        out_shape=jax.ShapeDtypeStruct((n, h * w, cout4_pad), out_dtype),
        grid_spec=pltpu.PrefetchScalarGridSpec(
            num_scalar_prefetch=0,
            grid=(n, r_tiles),
            in_specs=[
                pl.BlockSpec((1, th, w_padded, cin), lambda b, r: (b, r, 0, 0)),
                pl.BlockSpec((1, th, w_padded, cin), lambda b, r: (b, r, 0, 0)),
                # TODO(synk): single-buffer these constant blocks
                # (pipeline_mode=pl.Buffered(1)) once large Cin*Cout makes the
                # duplicated weight buffer matter on v7x's 64 MiB VMEM.
                pl.BlockSpec((4 * cin, cout4_pad), lambda b, r: (0, 0)),
                pl.BlockSpec((1, cout4_pad), lambda b, r: (0, 0)),
            ],
            out_specs=pl.BlockSpec((1, th * w, cout4_pad),
                                   lambda b, r: (b, r, 0)),
        ),
        compiler_params=pltpu.CompilerParams(
            dimension_semantics=("parallel", "parallel"),
            vmem_limit_bytes=vmem_limit,
        ),
        cost_estimate=pl.CostEstimate(
            flops=int(flops), transcendentals=0,
            bytes_accessed=int(bytes_accessed)),
    )(x_a, x_b, w_big, b_big)

    # (N, H*W, C4p) -> (N, Cout, 2H, 2W): slice off lane padding, free
    # reshapes, and the single transpose the NCHW interface forces.
    # TODO(synk): skip this transpose if the consumer accepts NHWC output
    # (the extra output-sized HBM round trip hurts most on v5e).
    out = out_flat[:, :, :cout4].reshape(n, h, w, 2, 2, cout)  # [n,a,b,py,px,co]
    out = jnp.transpose(out, (0, 5, 1, 3, 2, 4))               # (N,Cout,H,2,W,2)
    return out.reshape(n, cout, STRIDE * h, STRIDE * w)


def _reference(x_nchw, w_t, bias):
    """Pure-JAX reference for ConvTranspose2d(k=3, s=2, p=1, output_padding=1)."""
    w_conv = jnp.transpose(jnp.flip(w_t, axis=(2, 3)), (1, 0, 2, 3))  # (Cout,Cin,3,3)
    y = lax.conv_general_dilated(
        x_nchw, w_conv,
        window_strides=(1, 1),
        padding=((1, 2), (1, 2)),
        lhs_dilation=(STRIDE, STRIDE),
        dimension_numbers=("NCHW", "OIHW", "NCHW"),
    )
    return y + bias[None, :, None, None]


if __name__ == "__main__":
    N, CIN, COUT, H, W = 2, 4, 8, 16, 16

    key = jax.random.PRNGKey(0)
    kx, kw, kb = jax.random.split(key, 3)

    x = jax.random.normal(kx, (N, CIN, H, W), jnp.float32)

    # Deterministic init matching PyTorch ConvTranspose2d parameter shapes.
    fan_in = COUT * KH * KW
    bound = 1.0 / (fan_in ** 0.5)
    w_t = jax.random.uniform(kw, (CIN, COUT, KH, KW), jnp.float32, -bound, bound)
    bias = jax.random.uniform(kb, (COUT,), jnp.float32, -bound, bound)

    ref = jax.block_until_ready(_reference(x, w_t, bias))

    # Exact (f32-operand) path.
    out = jax.block_until_ready(upsampling_block(x, w_t, bias))
    assert out.shape == (N, COUT, 2 * H, 2 * W), out.shape
    assert jnp.allclose(out, ref, atol=1e-4, rtol=1e-4), float(
        jnp.max(jnp.abs(out - ref)))

    # bf16-operand path (f32 MXU accumulation): relaxed tolerance.
    out_bf16 = jax.block_until_ready(
        upsampling_block(x, w_t, bias, use_bf16=True))
    assert jnp.allclose(out_bf16, ref, atol=5e-2, rtol=5e-2), float(
        jnp.max(jnp.abs(out_bf16 - ref)))

    print("KERNEL_OK")
</pallas_src>

<mosaic_0001>
module attributes {stable_mosaic.version = 11 : i64} {
  func.func @_deconv_phase_kernel(%arg0: i32, %arg1: i32, %arg2: memref<1x8x24x4xf32, #tpu.memory_space<vmem>>, %arg3: memref<1x8x24x4xf32, #tpu.memory_space<vmem>>, %arg4: memref<16x128xf32, #tpu.memory_space<vmem>>, %arg5: memref<1x128xf32, #tpu.memory_space<vmem>>, %arg6: memref<1x128x128xf32, #tpu.memory_space<vmem>>) attributes {dimension_semantics = [#tpu.dimension_semantics<parallel>, #tpu.dimension_semantics<parallel>], iteration_bounds = array<i64: 2, 2>, scalar_prefetch = 0 : i64, scratch_operands = 0 : i64, tpu.core_type = #tpu.core_type<tc>, window_params = [{transform_indices = @transform_0, window_bounds = array<i64: 1, 8, 24, 4>}, {transform_indices = @transform_1, window_bounds = array<i64: 1, 8, 24, 4>}, {pipeline_mode = #tpu.pipeline_mode<synchronous>, transform_indices = @transform_2, window_bounds = array<i64: 16, 128>}, {pipeline_mode = #tpu.pipeline_mode<synchronous>, transform_indices = @transform_3, window_bounds = array<i64: 1, 128>}, {transform_indices = @transform_4, window_bounds = array<i64: 1, 128, 128>}]} {
    %c0 = arith.constant 0 : index
    %c0_0 = arith.constant 0 : index
    %c0_1 = arith.constant 0 : index
    %c0_2 = arith.constant 0 : index
    %0 = vector.load %arg2[%c0, %c0_0, %c0_1, %c0_2] : memref<1x8x24x4xf32, #tpu.memory_space<vmem>>, vector<1x8x24x4xf32>
    %1 = vector.shape_cast %0 : vector<1x8x24x4xf32> to vector<8x24x4xf32>
    %c0_3 = arith.constant 0 : index
    %c0_4 = arith.constant 0 : index
    %c0_5 = arith.constant 0 : index
    %c0_6 = arith.constant 0 : index
    %2 = vector.load %arg3[%c0_3, %c0_4, %c0_5, %c0_6] : memref<1x8x24x4xf32, #tpu.memory_space<vmem>>, vector<1x8x24x4xf32>
    %3 = vector.shape_cast %2 : vector<1x8x24x4xf32> to vector<8x24x4xf32>
    %4 = vector.extract_strided_slice %1 {offsets = [0, 0, 0], sizes = [8, 16, 4], strides = [1, 1, 1]} : vector<8x24x4xf32> to vector<8x16x4xf32>
    %5 = vector.extract_strided_slice %1 {offsets = [0, 1, 0], sizes = [8, 16, 4], strides = [1, 1, 1]} : vector<8x24x4xf32> to vector<8x16x4xf32>
    %6 = vector.extract_strided_slice %3 {offsets = [0, 0, 0], sizes = [8, 16, 4], strides = [1, 1, 1]} : vector<8x24x4xf32> to vector<8x16x4xf32>
    %7 = vector.extract_strided_slice %3 {offsets = [0, 1, 0], sizes = [8, 16, 4], strides = [1, 1, 1]} : vector<8x24x4xf32> to vector<8x16x4xf32>
    %8 = tpu.concatenate %4, %5, %6, %7 in 2 : vector<8x16x4xf32>, vector<8x16x4xf32>, vector<8x16x4xf32>, vector<8x16x4xf32> -> vector<8x16x16xf32>
    %9 = vector.shape_cast %8 : vector<8x16x16xf32> to vector<128x16xf32>
    %c0_7 = arith.constant 0 : index
    %c0_8 = arith.constant 0 : index
    %10 = vector.load %arg4[%c0_7, %c0_8] : memref<16x128xf32, #tpu.memory_space<vmem>>, vector<16x128xf32>
    %cst = arith.constant dense<0.000000e+00> : vector<128x128xf32>
    %11 = tpu.matmul %9, %10, %cst {dimension_numbers = #tpu.dot_dimension_numbers<[1], [0], [0], [1], [0, 0, 1, 1], [], []>} : vector<128x16xf32>, vector<16x128xf32>, vector<128x128xf32> -> vector<128x128xf32>
    %c0_9 = arith.constant 0 : index
    %c0_10 = arith.constant 0 : index
    %12 = vector.load %arg5[%c0_9, %c0_10] : memref<1x128xf32, #tpu.memory_space<vmem>>, vector<1x128xf32>
    %13 = vector.broadcast %12 : vector<1x128xf32> to vector<128x128xf32>
    %14 = arith.addf %11, %13 : vector<128x128xf32>
    %c0_11 = arith.constant 0 : index
    %c0_12 = arith.constant 0 : index
    %c0_13 = arith.constant 0 : index
    %15 = vector.load %arg6[%c0_11, %c0_12, %c0_13] : memref<1x128x128xf32, #tpu.memory_space<vmem>>, vector<1x128x128xf32>
    %16 = vector.shape_cast %15 : vector<1x128x128xf32> to vector<128x128xf32>
    %17 = vector.shape_cast %14 : vector<128x128xf32> to vector<1x128x128xf32>
    tpu.vector_store %arg6[%c0_11, %c0_12, %c0_13], %17 {strides = array<i32>} : memref<1x128x128xf32, #tpu.memory_space<vmem>>, vector<1x128x128xf32>,
    return
  }
  func.func @transform_0(%arg0: i32, %arg1: i32) -> (i32, i32, i32, i32) {
    %c0_i32 = arith.constant 0 : i32
    %c0_i32_0 = arith.constant 0 : i32
    %c0_i32_1 = arith.constant 0 : i32
    return %arg0, %arg1, %c0_i32, %c0_i32_0 : i32, i32, i32, i32
  }
  func.func @transform_1(%arg0: i32, %arg1: i32) -> (i32, i32, i32, i32) {
    %c0_i32 = arith.constant 0 : i32
    %c0_i32_0 = arith.constant 0 : i32
    %c0_i32_1 = arith.constant 0 : i32
    return %arg0, %arg1, %c0_i32, %c0_i32_0 : i32, i32, i32, i32
  }
  func.func @transform_2(%arg0: i32, %arg1: i32) -> (i32, i32) {
    %c0_i32 = arith.constant 0 : i32
    %c0_i32_0 = arith.constant 0 : i32
    %c0_i32_1 = arith.constant 0 : i32
    return %c0_i32, %c0_i32_0 : i32, i32
  }
  func.func @transform_3(%arg0: i32, %arg1: i32) -> (i32, i32) {
    %c0_i32 = arith.constant 0 : i32
    %c0_i32_0 = arith.constant 0 : i32
    %c0_i32_1 = arith.constant 0 : i32
    return %c0_i32, %c0_i32_0 : i32, i32
  }
  func.func @transform_4(%arg0: i32, %arg1: i32) -> (i32, i32, i32) {
    %c0_i32 = arith.constant 0 : i32
    %c0_i32_0 = arith.constant 0 : i32
    return %arg0, %arg1, %c0_i32 : i32, i32, i32
  }
}

</mosaic_0001>

<bundles_post_ra>
// kernel: tile.8
= control target key start
LH: loop header
LB: loop body
LE: loop exit
PB: predicated region body
PF: predicated region fallthrough
CT: control target
= control target key end

     0   :  { %s22_s0 = inlined_call_operand.vmem [shape: f32[8], index: 0, kind: input, shape index: {}]   ;;  %s23_s1 = inlined_call_operand.vmem [shape: f32[4,8], index: 1, kind: output, shape index: {}]  }
   0x1   :  { %v4_v0 = vld [vmem:[%s22_s0] ss:$0 sm:$0xff] }
   0x2   :  { %5 = vst [vmem:[%s23_s1] sm:$0xf] %v4_v0 }

// kernel: tile.9
= control target key start
LH: loop header
LB: loop body
LE: loop exit
PB: predicated region body
PF: predicated region fallthrough
CT: control target
= control target key end

     0   :  { %vm7_vm0 = vcmask 64512   ;;  %s37_s8 = smov 8   ;;  %s38_s9 = smov 16   ;;  %vm13_vm1 = vcmask 261312   ;;  %vm19_vm2 = vcmask 195712   ;;  %vm25_vm3 = vcmask 130112   ;;  %s55_s0 = inlined_call_operand.vmem [shape: f32[4,8], index: 0, kind: input, shape index: {}]   ;;  %s56_s1 = inlined_call_operand.vmem [shape: f32[32], index: 1, kind: output, shape index: {}]  }
   0x1   :  { %v4_v0 = vld [vmem:[%s55_s0] sm:$0xf]  ;;  %s36_s0 = smov 24  }
   0x2   :  { %5 = vst [vmem:[#allocation1] sm:$0xf] %v4_v0 }
   0x9   :  { %v10_v1 = vld [vmem:[#allocation1 + $0x3] sm:$0x1]   ;;  %v22_v2 = vld [vmem:[#allocation1 + $0x1] sm:$0x1]   ;;  %v6_v3 = vld [vmem:[#allocation1] sm:$0x1]  }
   0xa   :  { %11 = vrot.lane.b32.xlu0 %v10_v1, %s36_s0  ;;  %23 = vrot.lane.b32.xlu1 %v22_v2, %s37_s8  ;;  %v16_v4 = vld [vmem:[#allocation1 + $0x2] sm:$0x1]   ;;  %8 = vst.msk [vmem:[#allocation0] sm:$0x1] %vm7_vm0, %v6_v3  }
   0xe   :  { %17 = vrot.lane.b32.xlu0 %v16_v4, %s38_s9 }
  0x7c   :  { %v12_v5 = vpop.permute.xlu0 %11   ;;  %v24_v6 = vpop.permute.xlu1 %23  }
  0x7d   :  { %14 = vst.msk [vmem:[#allocation0] sm:$0x1] %vm13_vm1, %v12_v5  }
  0x80   :  { %v18_v7 = vpop.permute.xlu0 %17  }
  0x81   :  { %20 = vst.msk [vmem:[#allocation0] sm:$0x1] %vm19_vm2, %v18_v7  }
  0x82   :  { %26 = vst.msk [vmem:[#allocation0] sm:$0x1] %vm25_vm3, %v24_v6  }
  0x89   :  { %v30_v8 = vld [vmem:[#allocation0] sm:$0x1] }
  0x8a   :  { %32 = vst [vmem:[%s56_s1] sm:$0x1] %v30_v8 }

// kernel: upsampling_block.1
= control target key start
LH: loop header
LB: loop body
LE: loop exit
PB: predicated region body
PF: predicated region fallthrough
CT: control target
= control target key end

     0   :  { %s1180_s15 = smov 0   ;;  %s1182_s16 = smov 0   ;;  %s1571_s0 = inlined_call_operand.vmem [shape: f32[2,16,24,4], index: 0, kind: input, shape index: {}]   ;;  %s1572_s1 = inlined_call_operand.vmem [shape: f32[2,16,24,4], index: 1, kind: input, shape index: {}]   ;;  %s1573_s2 = inlined_call_operand.vmem [shape: f32[16,128], index: 2, kind: input, shape index: {}]   ;;  %s1574_s3 = inlined_call_operand.vmem [shape: f32[1,128], index: 3, kind: input, shape index: {}]   ;;  %s1575_s4 = inlined_call_operand.vmem [shape: f32[2,256,128], index: 4, kind: output, shape index: {}]  }
   0x1   :  { %s1184_s17 = smov 0   ;;  %s1186_s18 = smov 0  }
   0x2   :  { %s1188_s19 = smov 0  }
   0x3 LB: > { %s23_s20 = sadd.s32 1, %s1142_s17  ;;  %s26_s21 = sadd.s32 1, %s1146_s18  ;;  %s1150_s19 = sphi %s1188_s19, %s14_s19   ;;  %s1146_s18 = sphi %s1186_s18, %s1579_s18   ;;  %s1142_s17 = sphi %s1184_s17, %s1578_s17   ;;  %s1138_s16 = sphi %s1182_s16, %s1577_s16   ;;  %s1134_s15 = sphi %s1180_s15, %s1576_s15  }
   0x4   : > { %p24_p0 = scmp.ge.s32.totalorder %s23_s20, 2  ;;  %p988_p1 = scmp.ge.s32.totalorder %s1150_s19, 1 }
   0x5   : > { %p202_p2 = scmp.lt.s32.totalorder %s1150_s19, 5 }
   0x6   : > { %s1581_s20 = smov (%p24_p0, %s23_s20), 0  ;;  %s1583_s21 = smov (!%p24_p0, %s26_s21), %s1146_s18 }
   0x7   : > { %p203_p3 = pnand %p988_p1, %p202_p2  ;;  %p28_p4 = scmp.ge.s32.totalorder %s1583_s21, 2 }
   0x8   : > { %s989_s22 = sshll.u32 (!%p203_p3), %s1134_s15, 3  ;;  %p248_p5 = scmp.lt.s32.totalorder (!%p203_p3), %s1138_s16, 1  ;;  %vm351_vm0 = vcmask (!%p203_p3), 1046528   ;;  %v651_v52 = vld [vmem:[%s1573_s2] sm:$0xff] (!%p203_p3)  ;;  %v652_v58 = vld [vmem:[%s1573_s2 + $0x8] sm:$0xff] (!%p203_p3)  ;;  %vm600_vm1 = vcmask (!%p203_p3), 31744  }
   0x9   : > { %s1585_s21 = smov (%p28_p4, %s1583_s21), 0  ;;  %206 = sbr.rel (%p203_p3) target bundleno = 449 (0x1c1), region = 36 }
   0xa   : > { %p250_p6 = scmp.lt.s32.totalorder (!%p203_p3), %s989_s22, 15  ;;  %s1152_s7 = smov (!%p203_p3), 8   ;;  %vm617_vm2 = vcmask (!%p203_p3), 64512   ;;  %vm634_vm3 = vcmask (!%p203_p3), 97280   ;;  %vm660_vm4 = vcmask (!%p203_p3), 130048  }
   0xb   : > { %s1153_s8 = smov (!%p203_p3), 4   ;;  %s1154_s9 = smov (!%p203_p3), 12  }
   0xc   : > { %s993_s14 = sshll.u32 (!%p203_p3), %s1134_s15, 4 }
   0xd   : > { %p272_p7 = scmp.lt.s32.totalorder (!%p203_p3), %s993_s14, 31 }
  0x10   : > { %s1587_s16 = smov (!%p248_p5, %s1138_s16), 1  ;;  %s1589_s22 = smov (!%p250_p6, %s989_s22), 15 }
  0x11   : > { %s1068_s23 = smul.u32 48, %s1587_s16  ;;  %s1591_s14 = smov (!%p272_p7, %s993_s14), 31 }
  0x12   : > { %s1067_s24 = smul.u32 3, %s1589_s22  ;;  %s994_s22 = sshll.u32 %s1587_s16, 5 }
  0x14   : > { %s254_s25 = sadd.s32 %s1068_s23, %s1067_s24  ;;  %s275_s23 = sadd.s32 %s994_s22, %s1591_s14 }
  0x15   : > { %s990_s26 = sshll.u32 %s254_s25, 3  ;;  %s995_s24 = sshll.u32 %s275_s23, 3 }
  0x16   : > { %s1219_s29 = scalar_lea.vmem %s1572_s1, %s990_s26  ;;  %s1224_s6 = scalar_lea.vmem %s1571_s0, %s990_s26 }
  0x17   : > { %v315_v0 = vld [vmem:[%s1219_s29 + $0x60] sm:$0xff]  ;;  %v316_v2 = vld [vmem:[%s1219_s29 + $0x68] sm:$0xff]  ;;  %v281_v5 = vld [vmem:[%s1224_s6 + $0x10] sm:$0xff] }
  0x18   : > { %v303_v1 = vld [vmem:[%s1219_s29] sm:$0xff]  ;;  %472 = vrot.lane.b32.xlu1 %v315_v0, %s1152_s7  ;;  %v304_v3 = vld [vmem:[%s1219_s29 + $0x8] sm:$0xff]  ;;  %v355_v9 = vrot.slane %v281_v5, 1  ;;  %v293_v11 = vld [vmem:[%s1224_s6 + $0x70] sm:$0xff]  ;;  %v532_v18 = vrot.slane %v315_v0, 1  ;;  %v533_v22 = vrot.slane %v316_v2, 1 }
  0x19   : > { %456 = vrot.lane.b32.xlu0 %v303_v1, %s1152_s7  ;;  %v1233_v4 = vld [vmem:[%s1224_s6 + $0x8] sm:$0xff]  ;;  %v1238_v7 = vld [vmem:[%s1224_s6] sm:$0xff]  ;;  %v375_v16 = vrot.slane %v293_v11, 1  ;;  %v512_v19 = vrot.slane %v303_v1, 1  ;;  %v317_v20 = vld [vmem:[%s1219_s29 + $0x70] sm:$0xff]  ;;  %v513_v23 = vrot.slane %v304_v3, 1 }
  0x1a   : > { %v353_v6 = vrot.slane %v1233_v4, 1  ;;  %v1241_v8 = vld [vmem:[%s1224_s6 + $0x68] sm:$0xff]  ;;  %v352_v10 = vrot.slane %v1238_v7, 1  ;;  %v1246_v12 = vld [vmem:[%s1224_s6 + $0x60] sm:$0xff]  ;;  %v305_v21 = vld [vmem:[%s1219_s29 + $0x10] sm:$0xff]  ;;  %v535_v26 = vrot.slane %v317_v20, 1  ;;  %v534_v32 = vsel %vm351_vm0, %v532_v18, %v533_v22 }
  0x1b   : > { %v373_v13 = vrot.slane %v1241_v8, 1  ;;  %v372_v17 = vrot.slane %v1246_v12, 1  ;;  %v515_v27 = vrot.slane %v305_v21, 1  ;;  %v1261_v28 = vld [vmem:[%s1224_s6 + $0x78] sm:$0xff]  ;;  %v1264_v29 = vld [vmem:[%s1224_s6 + $0x80] sm:$0xff]  ;;  %v514_v33 = vsel %vm351_vm0, %v512_v19, %v513_v23  ;;  %v1277_v34 = vld [vmem:[%s1224_s6 + $0xb0] sm:$0xff] }
  0x1c   : > { %474 = vrot.lane.b32.xlu1 %v316_v2, %s1152_s7  ;;  %v356_v14 = vsel %vm351_vm0, %v353_v6, %v355_v9  ;;  %v354_v15 = vsel %vm351_vm0, %v352_v10, %v353_v6  ;;  %v1269_v30 = vld [vmem:[%s1224_s6 + $0x18] sm:$0xff]  ;;  %v1272_v31 = vld [vmem:[%s1224_s6 + $0x20] sm:$0xff]  ;;  %v1280_v35 = vld [vmem:[%s1224_s6 + $0x50] sm:$0xff]  ;;  %v536_v40 = vsel %vm351_vm0, %v533_v22, %v535_v26  ;;  %v377_v42 = vrot.slane %v1261_v28, 1 }
  0x1d   : > { %458 = vrot.lane.b32.xlu0 %v304_v3, %s1152_s7  ;;  %v376_v24 = vsel %vm351_vm0, %v373_v13, %v375_v16  ;;  %v374_v25 = vsel %vm351_vm0, %v372_v17, %v373_v13  ;;  %v302_v36 = vld [vmem:[%s1224_s6 + $0xb8] sm:$0xff]  ;;  %v1285_v38 = vld [vmem:[%s1219_s29 + $0xa8] sm:$0xff]  ;;  %v516_v41 = vsel %vm351_vm0, %v513_v23, %v515_v27  ;;  %v378_v43 = vrot.slane %v1264_v29, 1  ;;  %v1295_v44 = vld [vmem:[%s1219_s29 + $0xb0] sm:$0xff] }
  0x1e   : > { %v290_v37 = vld [vmem:[%s1224_s6 + $0x58] sm:$0xff]  ;;  %v1288_v39 = vld [vmem:[%s1219_s29 + $0x48] sm:$0xff]  ;;  %v1298_v45 = vld [vmem:[%s1219_s29 + $0x50] sm:$0xff]  ;;  %v357_v47 = vrot.slane %v1269_v30, 1  ;;  %v358_v48 = vrot.slane %v1272_v31, 1  ;;  %v388_v49 = vrot.slane %v1277_v34, 1  ;;  %v1061_v2 = vpack.c.bf16 %v652_v58, %v651_v52 }
  0x1f   : > { %v326_v46 = vld [vmem:[%s1219_s29 + $0xb8] sm:$0xff]  ;;  %v390_v50 = vrot.slane %v302_v36, 1  ;;  %v296_v53 = vld [vmem:[%s1224_s6 + $0x88] sm:$0xff]  ;;  %v368_v54 = vrot.slane %v1280_v35, 1  ;;  %v370_v55 = vrot.slane %v290_v37, 1  ;;  %v547_v56 = vrot.slane %v1285_v38, 1 }
  0x20   : > { %394 = vrot.lane.b32.xlu1 %v356_v14, %s1153_s8  ;;  %v314_v51 = vld [vmem:[%s1219_s29 + $0x58] sm:$0xff]  ;;  %v527_v57 = vrot.slane %v1288_v39, 1  ;;  %v284_v59 = vld [vmem:[%s1224_s6 + $0x28] sm:$0xff]  ;;  %v548_v61 = vrot.slane %v1295_v44, 1  ;;  %v528_v62 = vrot.slane %v1298_v45, 1  ;;  %v550_v0 = vrot.slane %v326_v46, 1  ;;  %1062 = vmatprep.subr.bf16.mxu0 %v1061_v2 }
  0x21   : > { %392 = vrot.lane.b32.xlu0 %v354_v15, %s1153_s8  ;;  %v1321_v60 = vsel %vm351_vm0, %v388_v49, %v390_v50  ;;  %v1328_v63 = vsel %vm351_vm0, %v368_v54, %v370_v55  ;;  %v530_v1 = vrot.slane %v314_v51, 1  ;;  %v379_v3 = vsel %vm351_vm0, %v377_v42, %v378_v43  ;;  %1065 = vmatprep.subr.bf16.mxu1 %v1061_v2  ;;  %v318_v17 = vld [vmem:[%s1219_s29 + $0x78] sm:$0xff]  ;;  %v319_v19 = vld [vmem:[%s1219_s29 + $0x80] sm:$0xff]  ;;  %v308_v26 = vld [vmem:[%s1219_s29 + $0x28] sm:$0xff] }
  0x22   : > { %v380_v5 = vrot.slane %v296_v53, 1  ;;  %v1334_v6 = vsel %vm351_vm0, %v547_v56, %v548_v61  ;;  %v1337_v9 = vsel %vm351_vm0, %v527_v57, %v528_v62  ;;  %v359_v10 = vsel %vm351_vm0, %v357_v47, %v358_v48  ;;  %1064 = vmatpush3.bf16.msra.mxu0 %v1061_v2  ;;  %1066 = vmatpush3.bf16.msra.mxu1 %v1061_v2  ;;  %v306_v18 = vld [vmem:[%s1219_s29 + $0x18] sm:$0xff]  ;;  %v307_v20 = vld [vmem:[%s1219_s29 + $0x20] sm:$0xff]  ;;  %v1365_v37 = vld [vmem:[%s1224_s6 + $0x90] sm:$0xff] }
  0x23   : > { %v360_v11 = vrot.slane %v284_v59, 1  ;;  %v1341_v13 = vsel %vm351_vm0, %v548_v61, %v550_v0  ;;  %v1344_v14 = vsel %vm351_vm0, %v528_v62, %v530_v1  ;;  %v537_v21 = vrot.slane %v318_v17, 1  ;;  %v1374_v42 = vld [vmem:[%s1224_s6 + $0x38] sm:$0xff]  ;;  %v299_v52 = vld [vmem:[%s1224_s6 + $0xa0] sm:$0xff]  ;;  %v321_v62 = vld [vmem:[%s1219_s29 + $0x90] sm:$0xff] }
  0x24   : > { %410 = vrot.lane.b32.xlu1 %v376_v24, %s1153_s8  ;;  %v381_v15 = vsel %vm351_vm0, %v378_v43, %v380_v5  ;;  %v517_v22 = vrot.slane %v306_v18, 1  ;;  %v538_v23 = vrot.slane %v319_v19, 1  ;;  %v518_v24 = vrot.slane %v307_v20, 1  ;;  %v287_v53 = vld [vmem:[%s1224_s6 + $0x40] sm:$0xff]  ;;  %v309_v0 = vld [vmem:[%s1219_s29 + $0x30] sm:$0xff]  ;;  %v322_v1 = vld [vmem:[%s1219_s29 + $0x98] sm:$0xff] }
  0x25   : > { %408 = vrot.lane.b32.xlu0 %v374_v25, %s1153_s8  ;;  %v361_v16 = vsel %vm351_vm0, %v358_v48, %v360_v11  ;;  %v320_v25 = vld [vmem:[%s1219_s29 + $0x88] sm:$0xff]  ;;  %v520_v36 = vrot.slane %v308_v26, 1  ;;  %v382_v43 = vrot.slane %v1365_v37, 1  ;;  %v363_v51 = vrot.slane %v1374_v42, 1  ;;  %v310_v2 = vld [vmem:[%s1219_s29 + $0x38] sm:$0xff] }
  0x26   : > { %v539_v27 = vsel %vm351_vm0, %v537_v21, %v538_v23  ;;  %v385_v57 = vrot.slane %v299_v52, 1  ;;  %v365_v58 = vrot.slane %v287_v53, 1  ;;  %v522_v5 = vrot.slane %v309_v0, 1  ;;  %v1409_v21 = vld [vmem:[%s1224_s6 + $0xa8] sm:$0xff] }
  0x27   : > { %v521_v48 = vsel %vm351_vm0, %v518_v24, %v520_v36  ;;  %v523_v11 = vrot.slane %v310_v2, 1 }
  0x28   : > { %568 = vrot.lane.b32.xlu1 %v534_v32, %s1154_s9  ;;  %v519_v32 = vsel %vm351_vm0, %v517_v22, %v518_v24  ;;  %v366_v61 = vsel %vm351_vm0, %v363_v51, %v365_v58  ;;  %v1412_v22 = vld [vmem:[%s1224_s6 + $0x48] sm:$0xff] }
  0x29   : > { %552 = vrot.lane.b32.xlu0 %v514_v33, %s1154_s9  ;;  %v540_v33 = vrot.slane %v320_v25, 1  ;;  %v387_v25 = vrot.slane %v1409_v21, 1  ;;  %v367_v26 = vrot.slane %v1412_v22, 1 }
  0x2b   : > { %v541_v47 = vsel %vm351_vm0, %v538_v23, %v540_v33 }
  0x2c   : > { %570 = vrot.lane.b32.xlu1 %v536_v40, %s1154_s9  ;;  %v1368_v40 = vld [vmem:[%s1224_s6 + $0x98] sm:$0xff] }
  0x2d   : > { %554 = vrot.lane.b32.xlu0 %v516_v41, %s1154_s9  ;;  %v1371_v41 = vld [vmem:[%s1224_s6 + $0x30] sm:$0xff]  ;;  %v383_v46 = vrot.slane %v1368_v40, 1 }
  0x2e   : > { %v362_v50 = vrot.slane %v1371_v41, 1 }
  0x2f   : > { %v384_v55 = vsel %vm351_vm0, %v382_v43, %v383_v46  ;;  %v386_v59 = vsel %vm351_vm0, %v383_v46, %v385_v57 }
  0x30   : > { %412 = vrot.lane.b32.xlu1 %v379_v3, %s1153_s8  ;;  %v364_v56 = vsel %vm351_vm0, %v362_v50, %v363_v51  ;;  %v542_v3 = vrot.slane %v321_v62, 1 }
  0x31   : > { %396 = vrot.lane.b32.xlu0 %v359_v10, %s1153_s8  ;;  %v543_v10 = vrot.slane %v322_v1, 1 }
  0x34   : > { %414 = vrot.lane.b32.xlu1 %v381_v15, %s1153_s8  ;;  %v323_v15 = vld [vmem:[%s1219_s29 + $0xa0] sm:$0xff] }
  0x35   : > { %398 = vrot.lane.b32.xlu0 %v361_v16, %s1153_s8  ;;  %v311_v16 = vld [vmem:[%s1219_s29 + $0x40] sm:$0xff]  ;;  %s1538_s29 = scalar_lea.vmem %s1575_s4, %s995_s24 }
  0x38   : > { %476 = vrot.lane.b32.xlu1 %v318_v17, %s1152_s7  ;;  %v544_v17 = vsel %vm351_vm0, %v542_v3, %v543_v10 }
  0x39   : > { %460 = vrot.lane.b32.xlu0 %v306_v18, %s1152_s7  ;;  %v524_v18 = vsel %vm351_vm0, %v522_v5, %v523_v11 }
  0x3c   : > { %478 = vrot.lane.b32.xlu1 %v319_v19, %s1152_s7  ;;  %v545_v19 = vrot.slane %v323_v15, 1 }
  0x3d   : > { %462 = vrot.lane.b32.xlu0 %v307_v20, %s1152_s7  ;;  %v525_v20 = vrot.slane %v311_v16, 1 }
  0x3e   : > { %v546_v23 = vsel %vm351_vm0, %v543_v10, %v545_v19 }
  0x3f   : > { %v526_v24 = vsel %vm351_vm0, %v523_v11, %v525_v20 }
  0x40   : > { %572 = vrot.lane.b32.xlu1 %v539_v27, %s1154_s9  ;;  %v389_v27 = vsel %vm351_vm0, %v387_v25, %v388_v49 }
  0x41   : > { %556 = vrot.lane.b32.xlu0 %v519_v32, %s1154_s9  ;;  %v369_v32 = vsel %vm351_vm0, %v367_v26, %v368_v54 }
  0x44   : > { %574 = vrot.lane.b32.xlu1 %v541_v47, %s1154_s9 }
  0x45   : > { %558 = vrot.lane.b32.xlu0 %v521_v48, %s1154_s9 }
  0x48   : > { %416 = vrot.lane.b32.xlu1 %v384_v55, %s1153_s8 }
  0x49   : > { %400 = vrot.lane.b32.xlu0 %v364_v56, %s1153_s8 }
  0x4c   : > { %418 = vrot.lane.b32.xlu1 %v386_v59, %s1153_s8 }
  0x4d   : > { %402 = vrot.lane.b32.xlu0 %v366_v61, %s1153_s8 }
  0x50   : > { %480 = vrot.lane.b32.xlu1 %v321_v62, %s1152_s7 }
  0x51   : > { %464 = vrot.lane.b32.xlu0 %v309_v0, %s1152_s7 }
  0x54   : > { %482 = vrot.lane.b32.xlu1 %v322_v1, %s1152_s7 }
  0x55   : > { %466 = vrot.lane.b32.xlu0 %v310_v2, %s1152_s7 }
  0x58   : > { %576 = vrot.lane.b32.xlu1 %v544_v17, %s1154_s9 }
  0x59   : > { %560 = vrot.lane.b32.xlu0 %v524_v18, %s1154_s9 }
  0x5c   : > { %578 = vrot.lane.b32.xlu1 %v546_v23, %s1154_s9 }
  0x5d   : > { %562 = vrot.lane.b32.xlu0 %v526_v24, %s1154_s9 }
  0x60   : > { %420 = vrot.lane.b32.xlu1 %v389_v27, %s1153_s8 }
  0x61   : > { %404 = vrot.lane.b32.xlu0 %v369_v32, %s1153_s8 }
  0x64   : > { %422 = vrot.lane.b32.xlu1 %v1321_v60, %s1153_s8 }
  0x65   : > { %406 = vrot.lane.b32.xlu0 %v1328_v63, %s1153_s8 }
  0x68   : > { %484 = vrot.lane.b32.xlu1 %v1285_v38, %s1152_s7 }
  0x69   : > { %468 = vrot.lane.b32.xlu0 %v1288_v39, %s1152_s7 }
  0x6c   : > { %486 = vrot.lane.b32.xlu1 %v1295_v44, %s1152_s7 }
  0x6d   : > { %470 = vrot.lane.b32.xlu0 %v1298_v45, %s1152_s7 }
  0x70   : > { %580 = vrot.lane.b32.xlu1 %v1334_v6, %s1154_s9 }
  0x71   : > { %564 = vrot.lane.b32.xlu0 %v1337_v9, %s1154_s9 }
  0x74   : > { %582 = vrot.lane.b32.xlu1 %v1341_v13, %s1154_s9 }
  0x75   : > { %566 = vrot.lane.b32.xlu0 %v1344_v14, %s1154_s9 }
  0x8a   : > { %v473_v38 = vpop.permute.xlu1 %472 }
  0x8b   : > { %v457_v39 = vpop.permute.xlu0 %456 }
  0x8e   : > { %v475_v49 = vpop.permute.xlu1 %474 }
  0x8f   : > { %v459_v54 = vpop.permute.xlu0 %458 }
  0x92   : > { %v395_v44 = vpop.permute.xlu1 %394 }
  0x93   : > { %v393_v60 = vpop.permute.xlu0 %392  ;;  %v602_v43 = vsel %vm600_vm1, %v1233_v4, %v395_v44 }
  0x94   : > { %v601_v6 = vsel %vm600_vm1, %v1238_v7, %v393_v60  ;;  %v619_v50 = vsel %vm617_vm2, %v602_v43, %v459_v54 }
  0x95   : > { %v618_v33 = vsel %vm617_vm2, %v601_v6, %v457_v39 }
  0x96   : > { %v411_v45 = vpop.permute.xlu1 %410 }
  0x97   : > { %v409_v63 = vpop.permute.xlu0 %408  ;;  %v610_v46 = vsel %vm600_vm1, %v1241_v8, %v411_v45 }
  0x98   : > { %v609_v9 = vsel %vm600_vm1, %v1246_v12, %v409_v63  ;;  %v627_v12 = vsel %vm617_vm2, %v610_v46, %v475_v49 }
  0x99   : > { %v626_v36 = vsel %vm617_vm2, %v609_v9, %v473_v38 }
  0x9a   : > { %v569_v13 = vpop.permute.xlu1 %568 }
  0x9b   : > { %v553_v14 = vpop.permute.xlu0 %552  ;;  %v643_v47 = vsel %vm634_vm3, %v626_v36, %v569_v13 }
  0x9c   : > { %v635_v7 = vsel %vm634_vm3, %v618_v33, %v553_v14  ;;  %1049 = vmatprep.mubr.msk.f32.mxu1 %vm660_vm4, %v643_v47 }
  0x9d   : > { %1037 = vmatprep.mubr.msk.f32.mxu0 %vm660_vm4, %v635_v7 }
  0x9e   : > { %v571_v48 = vpop.permute.xlu1 %570 }
  0x9f   : > { %v555_v51 = vpop.permute.xlu0 %554  ;;  %v644_v52 = vsel %vm634_vm3, %v627_v12, %v571_v48 }
  0xa0   : > { %v636_v4 = vsel %vm634_vm3, %v619_v50, %v555_v51  ;;  %1050 = vmatmul.mubr.msk.f32.vlgmr.msra.gmra.mrb[0].mxu1 %vm660_vm4, %v644_v52 }
  0xa1   : > { %1038 = vmatmul.mubr.msk.f32.vlgmr.msra.gmra.mrb[0].mxu0 %vm660_vm4, %v636_v4 }
  0xa2   : > { %v413_v8 = vpop.permute.xlu1 %412 }
  0xa3   : > { %v397_v53 = vpop.permute.xlu0 %396  ;;  %v611_v62 = vsel %vm600_vm1, %v1261_v28, %v413_v8 }
  0xa4   : > { %v603_v0 = vsel %vm600_vm1, %v1269_v30, %v397_v53 }
  0xa6   : > { %v415_v55 = vpop.permute.xlu1 %414 }
  0xa7   : > { %v399_v56 = vpop.permute.xlu0 %398  ;;  %v612_v28 = vsel %vm600_vm1, %v1264_v29, %v415_v55 }
  0xa8   : > { %v604_v30 = vsel %vm600_vm1, %v1272_v31, %v399_v56 }
  0xaa   : > { %v477_v57 = vpop.permute.xlu1 %476 }
  0xab   : > { %v461_v58 = vpop.permute.xlu0 %460  ;;  %v628_v1 = vsel %vm617_vm2, %v611_v62, %v477_v57 }
  0xac   : > { %v620_v2 = vsel %vm617_vm2, %v603_v0, %v461_v58 }
  0xae   : > { %v479_v59 = vpop.permute.xlu1 %478 }
  0xaf   : > { %v463_v61 = vpop.permute.xlu0 %462  ;;  %v629_v15 = vsel %vm617_vm2, %v612_v28, %v479_v59 }
  0xb0   : > { %v621_v16 = vsel %vm617_vm2, %v604_v30, %v463_v61 }
  0xb2   : > { %v573_v3 = vpop.permute.xlu1 %572 }
  0xb3   : > { %v557_v5 = vpop.permute.xlu0 %556  ;;  %v645_v10 = vsel %vm634_vm3, %v628_v1, %v573_v3 }
  0xb4   : > { %v637_v11 = vsel %vm634_vm3, %v620_v2, %v557_v5  ;;  %1052 = vmatprep.mubr.msk.f32.mxu1 %vm660_vm4, %v645_v10 }
  0xb5   : > { %1040 = vmatprep.mubr.msk.f32.mxu0 %vm660_vm4, %v637_v11 }
  0xb6   : > { %v575_v17 = vpop.permute.xlu1 %574 }
  0xb7   : > { %v559_v18 = vpop.permute.xlu0 %558  ;;  %v646_v19 = vsel %vm634_vm3, %v629_v15, %v575_v17 }
  0xb8   : > { %v638_v20 = vsel %vm634_vm3, %v621_v16, %v559_v18  ;;  %1053 = vmatmul.mubr.msk.f32.gmra.mrb[2].mxu1 %vm660_vm4, %v646_v19 }
  0xb9   : > { %1041 = vmatmul.mubr.msk.f32.gmra.mrb[2].mxu0 %vm660_vm4, %v638_v20 }
  0xba   : > { %v417_v23 = vpop.permute.xlu1 %416 }
  0xbb   : > { %v401_v24 = vpop.permute.xlu0 %400  ;;  %v613_v38 = vsel %vm600_vm1, %v1365_v37, %v417_v23 }
  0xbc   : > { %v605_v39 = vsel %vm600_vm1, %v1371_v41, %v401_v24 }
  0xbe   : > { %v419_v29 = vpop.permute.xlu1 %418 }
  0xbf   : > { %v403_v25 = vpop.permute.xlu0 %402  ;;  %v614_v37 = vsel %vm600_vm1, %v1368_v40, %v419_v29 }
  0xc0   : > { %v606_v41 = vsel %vm600_vm1, %v1374_v42, %v403_v25 }
  0xc2   : > { %v481_v26 = vpop.permute.xlu1 %480 }
  0xc3   : > { %v465_v31 = vpop.permute.xlu0 %464  ;;  %v630_v49 = vsel %vm617_vm2, %v613_v38, %v481_v26 }
  0xc4   : > { %v622_v54 = vsel %vm617_vm2, %v605_v39, %v465_v31 }
  0xc6   : > { %v483_v27 = vpop.permute.xlu1 %482 }
  0xc7   : > { %v467_v32 = vpop.permute.xlu0 %466  ;;  %v631_v6 = vsel %vm617_vm2, %v614_v37, %v483_v27 }
  0xc8   : > { %v623_v9 = vsel %vm617_vm2, %v606_v41, %v467_v32 }
  0xca   : > { %v577_v44 = vpop.permute.xlu1 %576 }
  0xcb   : > { %v561_v60 = vpop.permute.xlu0 %560  ;;  %v647_v45 = vsel %vm634_vm3, %v630_v49, %v577_v44 }
  0xcc   : > { %v639_v63 = vsel %vm634_vm3, %v622_v54, %v561_v60  ;;  %1055 = vmatprep.mubr.msk.f32.mxu1 %vm660_vm4, %v647_v45 }
  0xcd   : > { %1043 = vmatprep.mubr.msk.f32.mxu0 %vm660_vm4, %v639_v63 }
  0xce   : > { %v579_v13 = vpop.permute.xlu1 %578 }
  0xcf   : > { %v563_v14 = vpop.permute.xlu0 %562  ;;  %v648_v33 = vsel %vm634_vm3, %v631_v6, %v579_v13 }
  0xd0   : > { %v640_v36 = vsel %vm634_vm3, %v623_v9, %v563_v14  ;;  %1056 = vmatmul.mubr.msk.f32.gmra.mrb[4].mxu1 %vm660_vm4, %v648_v33 }
  0xd1   : > { %1044 = vmatmul.mubr.msk.f32.gmra.mrb[4].mxu0 %vm660_vm4, %v640_v36 }
  0xd2   : > { %v421_v43 = vpop.permute.xlu1 %420 }
  0xd3   : > { %v405_v46 = vpop.permute.xlu0 %404  ;;  %v615_v50 = vsel %vm600_vm1, %v1409_v21, %v421_v43 }
  0xd4   : > { %v607_v51 = vsel %vm600_vm1, %v1412_v22, %v405_v46 }
  0xd6   : > { %v423_v40 = vpop.permute.xlu1 %422 }
  0xd7   : > { %v407_v7 = vpop.permute.xlu0 %406  ;;  %v616_v21 = vsel %vm600_vm1, %v1277_v34, %v423_v40  ;;  %v996_v34 = vld [vmem:[%s1574_s3] ss:$0 sm:$0xff] }
  0xd8   : > { %v608_v22 = vsel %vm600_vm1, %v1280_v35, %v407_v7 }
  0xda   : > { %v485_v47 = vpop.permute.xlu1 %484 }
  0xdb   : > { %v469_v42 = vpop.permute.xlu0 %468  ;;  %v632_v52 = vsel %vm617_vm2, %v615_v50, %v485_v47 }
  0xdc   : > { %v624_v4 = vsel %vm617_vm2, %v607_v51, %v469_v42 }
  0xde   : > { %v487_v12 = vpop.permute.xlu1 %486 }
  0xdf   : > { %v471_v48 = vpop.permute.xlu0 %470  ;;  %v633_v57 = vsel %vm617_vm2, %v616_v21, %v487_v12 }
  0xe0   : > { %v625_v58 = vsel %vm617_vm2, %v608_v22, %v471_v48 }
  0xe2   : > { %v581_v8 = vpop.permute.xlu1 %580 }
  0xe3   : > { %v565_v53 = vpop.permute.xlu0 %564  ;;  %v649_v55 = vsel %vm634_vm3, %v632_v52, %v581_v8 }
  0xe4   : > { %v641_v56 = vsel %vm634_vm3, %v624_v4, %v565_v53  ;;  %1058 = vmatprep.mubr.msk.f32.mxu1 %vm660_vm4, %v649_v55 }
  0xe5   : > { %1046 = vmatprep.mubr.msk.f32.mxu0 %vm660_vm4, %v641_v56 }
  0xe6   : > { %v583_v59 = vpop.permute.xlu1 %582 }
  0xe7   : > { %v567_v61 = vpop.permute.xlu0 %566  ;;  %v650_v62 = vsel %vm634_vm3, %v633_v57, %v583_v59 }
  0xe8   : > { %v642_v0 = vsel %vm634_vm3, %v625_v58, %v567_v61  ;;  %1059 = vmatmul.mubr.msk.f32.gmra.mrb[6].mxu1 %vm660_vm4, %v650_v62 }
  0xe9   : > { %1047 = vmatmul.mubr.msk.f32.gmra.mrb[6].mxu0 %vm660_vm4, %v642_v0 }
 0x173   : > { %v1051_v1 = vpop.f32.mrb[0].mxu1 }
 0x174   : > { %v1039_v35 = vpop.f32.mrb[0].mxu0  ;;  %v821_v3 = vadd.f32 %v1051_v1, %v996_v34  ;;  %v815_v10 = vpop.f32.mrb[1].mxu1 }
 0x175   : > { %v781_v2 = vadd.f32 %v1039_v35, %v996_v34  ;;  %v775_v5 = vpop.f32.mrb[1].mxu0  ;;  %v816_v28 = vadd.f32 %v996_v34, %v815_v10 }
 0x176   : > { %v776_v11 = vadd.f32 %v996_v34, %v775_v5  ;;  %863 = vst [vmem:[%s1538_s29 + $0x48] sm:$0xff] %v821_v3 }
 0x177   : > { %855 = vst [vmem:[%s1538_s29 + $0x8] sm:$0xff] %v781_v2  ;;  %862 = vst [vmem:[%s1538_s29 + $0x40] sm:$0xff] %v816_v28 }
 0x178   : > { %854 = vst [vmem:[%s1538_s29] sm:$0xff] %v776_v11 }
 0x18b   : > { %v1054_v15 = vpop.f32.mrb[2].mxu1 }
 0x18c   : > { %v1042_v30 = vpop.f32.mrb[2].mxu0  ;;  %v831_v17 = vadd.f32 %v1054_v15, %v996_v34  ;;  %v825_v19 = vpop.f32.mrb[3].mxu1 }
 0x18d   : > { %v791_v16 = vadd.f32 %v1042_v30, %v996_v34  ;;  %v785_v18 = vpop.f32.mrb[3].mxu0  ;;  %v826_v23 = vadd.f32 %v996_v34, %v825_v19 }
 0x18e   : > { %v786_v20 = vadd.f32 %v996_v34, %v785_v18  ;;  %865 = vst [vmem:[%s1538_s29 + $0x58] sm:$0xff] %v831_v17 }
 0x18f   : > { %857 = vst [vmem:[%s1538_s29 + $0x18] sm:$0xff] %v791_v16  ;;  %864 = vst [vmem:[%s1538_s29 + $0x50] sm:$0xff] %v826_v23 }
 0x190   : > { %856 = vst [vmem:[%s1538_s29 + $0x10] sm:$0xff] %v786_v20 }
 0x1a3   : > { %v1057_v29 = vpop.f32.mrb[4].mxu1 }
 0x1a4   : > { %v1045_v24 = vpop.f32.mrb[4].mxu0  ;;  %v841_v26 = vadd.f32 %v1057_v29, %v996_v34  ;;  %v835_v27 = vpop.f32.mrb[5].mxu1 }
 0x1a5   : > { %v801_v25 = vadd.f32 %v1045_v24, %v996_v34  ;;  %v795_v31 = vpop.f32.mrb[5].mxu0  ;;  %v836_v38 = vadd.f32 %v996_v34, %v835_v27 }
 0x1a6   : > { %v796_v32 = vadd.f32 %v996_v34, %v795_v31  ;;  %867 = vst [vmem:[%s1538_s29 + $0x68] sm:$0xff] %v841_v26 }
 0x1a7   : > { %859 = vst [vmem:[%s1538_s29 + $0x28] sm:$0xff] %v801_v25  ;;  %866 = vst [vmem:[%s1538_s29 + $0x60] sm:$0xff] %v836_v38 }
 0x1a8   : > { %858 = vst [vmem:[%s1538_s29 + $0x20] sm:$0xff] %v796_v32 }
 0x1bb   : > { %v1060_v49 = vpop.f32.mrb[6].mxu1 }
 0x1bc   : > { %v1048_v39 = vpop.f32.mrb[6].mxu0  ;;  %v851_v44 = vadd.f32 %v1060_v49, %v996_v34  ;;  %v845_v45 = vpop.f32.mrb[7].mxu1 }
 0x1bd   : > { %v811_v54 = vadd.f32 %v1048_v39, %v996_v34  ;;  %v805_v60 = vpop.f32.mrb[7].mxu0  ;;  %v846_v37 = vadd.f32 %v996_v34, %v845_v45 }
 0x1be   : > { %v806_v63 = vadd.f32 %v996_v34, %v805_v60  ;;  %869 = vst [vmem:[%s1538_s29 + $0x78] sm:$0xff] %v851_v44 }
 0x1bf   : > { %861 = vst [vmem:[%s1538_s29 + $0x38] sm:$0xff] %v811_v54  ;;  %868 = vst [vmem:[%s1538_s29 + $0x70] sm:$0xff] %v846_v37 }
 0x1c0   : > { %860 = vst [vmem:[%s1538_s29 + $0x30] sm:$0xff] %v806_v63 }
 0x1c1 PF: > { %s14_s19 = sadd.s32 1, %s1150_s19   ;;  %s1576_s15 = smov %s1142_s17 }
 0x1c2   : > { %p11_p8 = scmp.ge.s32.totalorder %s14_s19, 6   ;;  %s1577_s16 = smov %s1146_s18 }
 0x1c3   : > { %s1578_s17 = smov %s1581_s20  ;;  %s1579_s18 = smov %s1585_s21 }
 0x1c4   :  { %13 = sbr.rel (!%p11_p8) target bundleno = 3 (0x3), region = 69 }

</bundles_post_ra>
